<compile_context>
chip_gen: v6e
topology: v6e:2x2x1
jax: 0.10.0
libtpu: 0.0.40
codegen_flags: <defaults>
</compile_context>

<pallas_src>
import functools
import math

import jax
import jax.numpy as jnp
from jax.experimental import pallas as pl
from jax.experimental.pallas import tpu as pltpu


# ---------------------------------------------------------------------------
# Tiling helpers
# ---------------------------------------------------------------------------

def _pick_row_tile(rows, row_bytes, budget=8 << 20):
    """Largest multiple-of-8 tile dividing `rows` whose per-step VMEM stays
    under `budget`; falls back to full rows."""
    if rows % 8 != 0:
        # TODO(synk): no remainder/masking path for ragged row counts.
        return rows
    best = None
    for cand in (1024, 512, 256, 128, 64, 32, 16, 8):
        if rows % cand == 0:
            if best is None:
                best = cand
            if cand * row_bytes <= budget:
                return cand
    return best if best is not None else rows


def _pick_ff_chunk(ff, e, wbytes, budget=8 << 20):
    """dim_ff chunk: multiple of 128 (or full), capped by weight-block VMEM."""
    if ff % 128 != 0:
        return ff
    best = ff
    for cand in (4096, 2048, 1024, 512, 256, 128):
        if ff % cand == 0:
            best = cand
            if 4 * cand * e * wbytes <= budget:   # W1 + W2 blocks, double-buffered
                return cand
    return best


# ---------------------------------------------------------------------------
# Kernels
# ---------------------------------------------------------------------------

def _attn_block_kernel(x_ref, wi_ref, bi_ref, wo_ref, bo_ref, g_ref, b_ref,
                       mask_ref, kp_ref, o_ref, *, num_heads, scale, eps,
                       mm_dtype):
    """Per-batch: QKV proj -> per-head SDPA -> out proj -> +residual -> LN1."""
    x = x_ref[...]                                    # (S, E)
    xf = x.astype(jnp.float32)
    S, E = x.shape
    Dh = E // num_heads

    qkv = (jnp.dot(x.astype(mm_dtype), wi_ref[...].astype(mm_dtype),
                   preferred_element_type=jnp.float32)
           + bi_ref[...].astype(jnp.float32))          # (S, 3E), f32

    # Shared additive mask + per-batch key-padding bias (broadcast over rows).
    bias = mask_ref[...].astype(jnp.float32) + kp_ref[...].astype(jnp.float32)

    head_outs = []
    for h in range(num_heads):                         # static unroll
        q = qkv[:, h * Dh:(h + 1) * Dh]
        k = qkv[:, E + h * Dh:E + (h + 1) * Dh]
        v = qkv[:, 2 * E + h * Dh:2 * E + (h + 1) * Dh]
        # scores = q @ k^T (contract last dims; no explicit transpose)
        s = jax.lax.dot_general(q.astype(mm_dtype), k.astype(mm_dtype),
                                (((1,), (1,)), ((), ())),
                                preferred_element_type=jnp.float32)
        s = s * scale + bias                           # (S, S)
        m = jnp.max(s, axis=-1, keepdims=True)
        p = jnp.exp(s - m)
        l = jnp.sum(p, axis=-1, keepdims=True)         # (S, 1)
        o = jnp.dot(p.astype(mm_dtype), v.astype(mm_dtype),
                    preferred_element_type=jnp.float32)  # (S, Dh)
        # Fold 1/l into the small (S, Dh) output; reciprocal on EUP.
        head_outs.append(o * pl.reciprocal(l, approx=True))

    attn = jnp.concatenate(head_outs, axis=-1)          # (S, E), lane-dense

    y = (jnp.dot(attn.astype(mm_dtype), wo_ref[...].astype(mm_dtype),
                 preferred_element_type=jnp.float32)
         + bo_ref[...].astype(jnp.float32) + xf)

    mean = jnp.mean(y, axis=-1, keepdims=True)
    cen = y - mean
    var = jnp.mean(cen * cen, axis=-1, keepdims=True)
    o_ref[...] = (cen * jax.lax.rsqrt(var + eps) * g_ref[...].astype(jnp.float32)
                  + b_ref[...].astype(jnp.float32)).astype(o_ref.dtype)


def _ffn_block_kernel(x_ref, w1_ref, b1_ref, w2_ref, b2_ref, g_ref, b_ref,
                      o_ref, acc_ref, *, eps, mm_dtype):
    """Fused FFN: acc += relu(x @ W1[:,chunk] + b1) @ W2[chunk,:]; on the last
    dim_ff chunk add bias, residual and LayerNorm2."""
    @pl.when(pl.program_id(1) == 0)
    def _():
        acc_ref[...] = jnp.zeros_like(acc_ref)

    h = jnp.dot(x_ref[...].astype(mm_dtype), w1_ref[...].astype(mm_dtype),
                preferred_element_type=jnp.float32)
    h = jnp.maximum(h + b1_ref[...].astype(jnp.float32), 0.0)
    acc_ref[...] += jnp.dot(h.astype(mm_dtype), w2_ref[...].astype(mm_dtype),
                            preferred_element_type=jnp.float32)

    @pl.when(pl.program_id(1) == pl.num_programs(1) - 1)
    def _():
        y = (acc_ref[...] + b2_ref[...].astype(jnp.float32)
             + x_ref[...].astype(jnp.float32))
        mean = jnp.mean(y, axis=-1, keepdims=True)
        cen = y - mean
        var = jnp.mean(cen * cen, axis=-1, keepdims=True)
        o_ref[...] = (cen * jax.lax.rsqrt(var + eps)
                      * g_ref[...].astype(jnp.float32)
                      + b_ref[...].astype(jnp.float32)).astype(o_ref.dtype)


def _ln_kernel(x_ref, g_ref, b_ref, o_ref, *, eps):
    y = x_ref[...].astype(jnp.float32)
    mean = jnp.mean(y, axis=-1, keepdims=True)
    cen = y - mean
    var = jnp.mean(cen * cen, axis=-1, keepdims=True)
    o_ref[...] = (cen * jax.lax.rsqrt(var + eps) * g_ref[...].astype(jnp.float32)
                  + b_ref[...].astype(jnp.float32)).astype(o_ref.dtype)


# ---------------------------------------------------------------------------
# pallas_call wrappers
# ---------------------------------------------------------------------------

def attention_block(x, p, mask2d, kp, *, num_heads, eps, mm_dtype):
    """x: (N, S, E) -> (N, S, E). One grid step per batch element."""
    N, S, E = x.shape
    scale = 1.0 / math.sqrt(E // num_heads)
    wi = p["in_w"].astype(mm_dtype)
    wo = p["out_w"].astype(mm_dtype)
    bi = p["in_b"].reshape(1, 3 * E).astype(jnp.float32)
    bo = p["out_b"].reshape(1, E).astype(jnp.float32)
    g1 = p["ln1_g"].reshape(1, E).astype(jnp.float32)
    b1 = p["ln1_b"].reshape(1, E).astype(jnp.float32)
    kernel = functools.partial(_attn_block_kernel, num_heads=num_heads,
                               scale=scale, eps=eps, mm_dtype=mm_dtype)
    return pl.pallas_call(
        kernel,
        out_shape=jax.ShapeDtypeStruct((N, S, E), x.dtype),
        grid=(N,),
        in_specs=[
            pl.BlockSpec((None, S, E), lambda n: (n, 0, 0)),      # x (per batch)
            pl.BlockSpec((E, 3 * E), lambda n: (0, 0)),           # in_w (resident)
            pl.BlockSpec((1, 3 * E), lambda n: (0, 0)),           # in_b
            pl.BlockSpec((E, E), lambda n: (0, 0)),               # out_w
            pl.BlockSpec((1, E), lambda n: (0, 0)),               # out_b
            pl.BlockSpec((1, E), lambda n: (0, 0)),               # ln1 gamma
            pl.BlockSpec((1, E), lambda n: (0, 0)),               # ln1 beta
            pl.BlockSpec((S, S), lambda n: (0, 0)),               # shared mask
            pl.BlockSpec((None, 1, S), lambda n: (n, 0, 0)),      # key padding
        ],
        out_specs=pl.BlockSpec((None, S, E), lambda n: (n, 0, 0)),
        compiler_params=pltpu.CompilerParams(dimension_semantics=("parallel",)),
    )(x, wi, bi, wo, bo, g1, b1, mask2d, kp)


def ffn_block(x2, p, *, eps, mm_dtype):
    """x2: (rows, E) -> (rows, E). Fused FFN + residual + LN2."""
    rows, E = x2.shape
    F = p["lin1_w"].shape[1]
    wbytes = jnp.dtype(mm_dtype).itemsize
    fchunk = _pick_ff_chunk(F, E, wbytes)
    # per-row VMEM: x + out double-buffered (f32) + acc + hidden chunk
    row_bytes = 16 * E + 4 * E + 4 * fchunk
    tile = _pick_row_tile(rows, row_bytes)
    w1 = p["lin1_w"].astype(mm_dtype)
    w2 = p["lin2_w"].astype(mm_dtype)
    b1 = p["lin1_b"].reshape(1, F).astype(jnp.float32)
    b2 = p["lin2_b"].reshape(1, E).astype(jnp.float32)
    g2 = p["ln2_g"].reshape(1, E).astype(jnp.float32)
    be2 = p["ln2_b"].reshape(1, E).astype(jnp.float32)
    kernel = functools.partial(_ffn_block_kernel, eps=eps, mm_dtype=mm_dtype)
    return pl.pallas_call(
        kernel,
        out_shape=jax.ShapeDtypeStruct((rows, E), x2.dtype),
        grid=(rows // tile, F // fchunk),
        in_specs=[
            pl.BlockSpec((tile, E), lambda i, k: (i, 0)),          # x (reused over k)
            pl.BlockSpec((E, fchunk), lambda i, k: (0, k)),        # W1 chunk
            pl.BlockSpec((1, fchunk), lambda i, k: (0, k)),        # b1 chunk
            pl.BlockSpec((fchunk, E), lambda i, k: (k, 0)),        # W2 chunk
            pl.BlockSpec((1, E), lambda i, k: (0, 0)),             # b2
            pl.BlockSpec((1, E), lambda i, k: (0, 0)),             # ln2 gamma
            pl.BlockSpec((1, E), lambda i, k: (0, 0)),             # ln2 beta
        ],
        out_specs=pl.BlockSpec((tile, E), lambda i, k: (i, 0)),
        scratch_shapes=[pltpu.VMEM((tile, E), jnp.float32)],
        compiler_params=pltpu.CompilerParams(
            dimension_semantics=("parallel", "arbitrary")),
    )(x2, w1, b1, w2, b2, g2, be2)


def layernorm(x2, gamma, beta, eps=1e-5):
    rows, d = x2.shape
    tile = _pick_row_tile(rows, 16 * d)
    return pl.pallas_call(
        functools.partial(_ln_kernel, eps=eps),
        out_shape=jax.ShapeDtypeStruct((rows, d), x2.dtype),
        grid=(rows // tile,),
        in_specs=[
            pl.BlockSpec((tile, d), lambda i: (i, 0)),
            pl.BlockSpec((1, d), lambda i: (0, 0)),
            pl.BlockSpec((1, d), lambda i: (0, 0)),
        ],
        out_specs=pl.BlockSpec((tile, d), lambda i: (i, 0)),
        compiler_params=pltpu.CompilerParams(dimension_semantics=("parallel",)),
    )(x2, gamma.reshape(1, d).astype(jnp.float32),
      beta.reshape(1, d).astype(jnp.float32))


# ---------------------------------------------------------------------------
# Module forward (matches TransformerEncoderRPR.forward semantics)
# ---------------------------------------------------------------------------

def transformer_encoder_rpr(src, layer_params, mask=None, norm_params=None,
                            src_key_padding_mask=None, *, num_heads, eps=1e-5,
                            mm_dtype=jnp.bfloat16):
    """output = layers[L-1](...layers[0](src)...); optional final norm.

    src: (S, N, E). Dropout is an eval-mode identity.
    """
    S, N, E = src.shape
    mask2d = (jnp.zeros((S, S), jnp.float32) if mask is None
              else mask.astype(jnp.float32))
    if src_key_padding_mask is not None:
        kp = jnp.where(src_key_padding_mask, -1e9, 0.0)
        kp = kp.astype(jnp.float32).reshape(N, 1, S)
    else:
        kp = jnp.zeros((N, 1, S), jnp.float32)

    # Batch-major layout for the whole stack (one transpose in, one out).
    x = jnp.transpose(src, (1, 0, 2))                     # (N, S, E)
    for p in layer_params:
        x = attention_block(x, p, mask2d, kp, num_heads=num_heads, eps=eps,
                            mm_dtype=mm_dtype)
        x = ffn_block(x.reshape(N * S, E), p, eps=eps,
                      mm_dtype=mm_dtype).reshape(N, S, E)
    if norm_params is not None:
        x = layernorm(x.reshape(N * S, E), norm_params["g"], norm_params["b"],
                      eps).reshape(N, S, E)
    return jnp.transpose(x, (1, 0, 2))                    # back to (S, N, E)


# ---------------------------------------------------------------------------
# Pure-JAX reference (f32, for correctness check)
# ---------------------------------------------------------------------------

def _ref_encoder(src, layers, mask, key_padding, norm, num_heads, eps=1e-5):
    S, N, E = src.shape
    H = num_heads
    Dh = E // H
    scale = 1.0 / math.sqrt(Dh)
    hp = jax.lax.Precision.HIGHEST
    bias = jnp.zeros((S, S), jnp.float32) if mask is None else mask.astype(jnp.float32)
    bias = jnp.broadcast_to(bias, (N, 1, S, S))
    if key_padding is not None:
        kp = jnp.where(key_padding, -1e9, 0.0).astype(jnp.float32)
        bias = bias + kp[:, None, None, :]

    def ln(x, g, b):
        m = jnp.mean(x, -1, keepdims=True)
        c = x - m
        v = jnp.mean(c * c, -1, keepdims=True)
        return c * jax.lax.rsqrt(v + eps) * g + b

    out = src
    for p in layers:
        x2 = out.reshape(S * N, E)
        qkv = jnp.dot(x2, p["in_w"], precision=hp) + p["in_b"]
        q, k, v = jnp.split(qkv, 3, axis=-1)
        heads = lambda t: t.reshape(S, N, H, Dh).transpose(1, 2, 0, 3)
        qh, kh, vh = heads(q), heads(k), heads(v)            # (N,H,S,Dh)
        s = jnp.einsum("nhqd,nhkd->nhqk", qh, kh, precision=hp) * scale + bias
        a = jax.nn.softmax(s, axis=-1)
        oh = jnp.einsum("nhqk,nhkd->nhqd", a, vh, precision=hp)
        o = oh.transpose(2, 0, 1, 3).reshape(S * N, E)
        attn = jnp.dot(o, p["out_w"], precision=hp) + p["out_b"]
        x2 = ln(x2 + attn, p["ln1_g"], p["ln1_b"])
        ff = jnp.maximum(jnp.dot(x2, p["lin1_w"], precision=hp) + p["lin1_b"], 0.0)
        ff = jnp.dot(ff, p["lin2_w"], precision=hp) + p["lin2_b"]
        x2 = ln(x2 + ff, p["ln2_g"], p["ln2_b"])
        out = x2.reshape(S, N, E)
    if norm is not None:
        out = ln(out, norm["g"], norm["b"])
    return out


# ---------------------------------------------------------------------------
# Parameter init
# ---------------------------------------------------------------------------

def init_params(key, num_layers, d_model, dim_ff, dtype=jnp.float32):
    layers = []
    s = 0.02
    for _ in range(num_layers):
        key, *ks = jax.random.split(key, 13)
        layers.append(dict(
            in_w=jax.random.normal(ks[0], (d_model, 3 * d_model), dtype) * s,
            in_b=jax.random.normal(ks[1], (3 * d_model,), dtype) * s,
            out_w=jax.random.normal(ks[2], (d_model, d_model), dtype) * s,
            out_b=jax.random.normal(ks[3], (d_model,), dtype) * s,
            lin1_w=jax.random.normal(ks[4], (d_model, dim_ff), dtype) * s,
            lin1_b=jax.random.normal(ks[5], (dim_ff,), dtype) * s,
            lin2_w=jax.random.normal(ks[6], (dim_ff, d_model), dtype) * s,
            lin2_b=jax.random.normal(ks[7], (d_model,), dtype) * s,
            ln1_g=1.0 + jax.random.normal(ks[8], (d_model,), dtype) * s,
            ln1_b=jax.random.normal(ks[9], (d_model,), dtype) * s,
            ln2_g=1.0 + jax.random.normal(ks[10], (d_model,), dtype) * s,
            ln2_b=jax.random.normal(ks[11], (d_model,), dtype) * s,
        ))
    key, kg, kb = jax.random.split(key, 3)
    norm = dict(g=1.0 + jax.random.normal(kg, (d_model,), dtype) * s,
                b=jax.random.normal(kb, (d_model,), dtype) * s)
    return layers, norm


# ---------------------------------------------------------------------------
# Demo / self-test
# ---------------------------------------------------------------------------

if __name__ == "__main__":
    S, N, E = 8, 2, 32            # seq, batch, d_model
    H, F, L = 4, 64, 2            # heads, ffn dim, num_layers

    key = jax.random.PRNGKey(0)
    k_src, k_par = jax.random.split(key)
    src = jax.random.normal(k_src, (S, N, E), dtype=jnp.float32)
    layers, norm = init_params(k_par, L, E, F)

    # Causal additive src mask (like generate_square_subsequent_mask).
    mask = jnp.where(jnp.triu(jnp.ones((S, S), jnp.bool_), k=1),
                     -1e9, 0.0).astype(jnp.float32)

    fwd = jax.jit(functools.partial(transformer_encoder_rpr, num_heads=H))
    out = jax.block_until_ready(fwd(src, layers, mask, norm))

    # Correctness check against a full-f32 pure-JAX reference.  Kernels use
    # bf16 MXU operands with f32 accumulation, so tolerance is loosened.
    ref = _ref_encoder(src, layers, mask, None, norm, H)

    assert out.shape == src.shape and out.dtype == src.dtype
    max_err = float(jnp.max(jnp.abs(out - ref)))
    assert max_err < 2e-2, max_err

    print("KERNEL_OK")
</pallas_src>

<mosaic_0001>
module attributes {stable_mosaic.version = 11 : i64} {
  func.func @_ffn_block_kernel(%arg0: i32, %arg1: i32, %arg2: memref<16x32xf32, #tpu.memory_space<vmem>>, %arg3: memref<32x64xbf16, #tpu.memory_space<vmem>>, %arg4: memref<1x64xf32, #tpu.memory_space<vmem>>, %arg5: memref<64x32xbf16, #tpu.memory_space<vmem>>, %arg6: memref<1x32xf32, #tpu.memory_space<vmem>>, %arg7: memref<1x32xf32, #tpu.memory_space<vmem>>, %arg8: memref<1x32xf32, #tpu.memory_space<vmem>>, %arg9: memref<16x32xf32, #tpu.memory_space<vmem>>, %arg10: memref<16x32xf32, #tpu.memory_space<vmem>>) attributes {dimension_semantics = [#tpu.dimension_semantics<parallel>, #tpu.dimension_semantics<arbitrary>], iteration_bounds = array<i64: 1, 1>, scalar_prefetch = 0 : i64, scratch_operands = 1 : i64, tpu.core_type = #tpu.core_type<tc>, window_params = [{transform_indices = @transform_0, window_bounds = array<i64: 16, 32>}, {transform_indices = @transform_1, window_bounds = array<i64: 32, 64>}, {transform_indices = @transform_2, window_bounds = array<i64: 1, 64>}, {transform_indices = @transform_3, window_bounds = array<i64: 64, 32>}, {pipeline_mode = #tpu.pipeline_mode<synchronous>, transform_indices = @transform_4, window_bounds = array<i64: 1, 32>}, {pipeline_mode = #tpu.pipeline_mode<synchronous>, transform_indices = @transform_5, window_bounds = array<i64: 1, 32>}, {pipeline_mode = #tpu.pipeline_mode<synchronous>, transform_indices = @transform_6, window_bounds = array<i64: 1, 32>}, {transform_indices = @transform_7, window_bounds = array<i64: 16, 32>}]} {
    %c0_i32 = arith.constant 0 : i32
    %0 = arith.cmpi eq, %arg1, %c0_i32 : i32
    %1 = arith.extui %0 : i1 to i32
    %c0_i32_0 = arith.constant 0 : i32
    %2 = arith.cmpi ne, %1, %c0_i32_0 : i32
    scf.if %2 {
      %cst_16 = arith.constant 0.000000e+00 : f32
      %21 = vector.broadcast %cst_16 : f32 to vector<16x32xf32>
      %c0_17 = arith.constant 0 : index
      %c0_18 = arith.constant 0 : index
      %22 = vector.load %arg10[%c0_17, %c0_18] : memref<16x32xf32, #tpu.memory_space<vmem>>, vector<16x32xf32>
      tpu.vector_store %arg10[%c0_17, %c0_18], %21 {strides = array<i32>} : memref<16x32xf32, #tpu.memory_space<vmem>>, vector<16x32xf32>,
    } else {
    }
    %c0 = arith.constant 0 : index
    %c0_1 = arith.constant 0 : index
    %3 = vector.load %arg2[%c0, %c0_1] : memref<16x32xf32, #tpu.memory_space<vmem>>, vector<16x32xf32>
    %4 = arith.truncf %3 : vector<16x32xf32> to vector<16x32xbf16>
    %c0_2 = arith.constant 0 : index
    %c0_3 = arith.constant 0 : index
    %5 = vector.load %arg3[%c0_2, %c0_3] : memref<32x64xbf16, #tpu.memory_space<vmem>>, vector<32x64xbf16>
    %cst = arith.constant dense<0.000000e+00> : vector<16x64xf32>
    %6 = tpu.matmul %4, %5, %cst {dimension_numbers = #tpu.dot_dimension_numbers<[1], [0], [0], [1], [0, 0, 1, 1], [], []>} : vector<16x32xbf16>, vector<32x64xbf16>, vector<16x64xf32> -> vector<16x64xf32>
    %c0_4 = arith.constant 0 : index
    %c0_5 = arith.constant 0 : index
    %7 = vector.load %arg4[%c0_4, %c0_5] : memref<1x64xf32, #tpu.memory_space<vmem>>, vector<1x64xf32>
    %8 = vector.broadcast %7 : vector<1x64xf32> to vector<16x64xf32>
    %9 = arith.addf %6, %8 : vector<16x64xf32>
    %cst_6 = arith.constant 0.000000e+00 : f32
    %10 = vector.broadcast %cst_6 : f32 to vector<16x64xf32>
    %11 = arith.maximumf %9, %10 : vector<16x64xf32>
    %c0_7 = arith.constant 0 : index
    %c0_8 = arith.constant 0 : index
    %12 = vector.load %arg10[%c0_7, %c0_8] : memref<16x32xf32, #tpu.memory_space<vmem>>, vector<16x32xf32>
    %13 = arith.truncf %11 : vector<16x64xf32> to vector<16x64xbf16>
    %c0_9 = arith.constant 0 : index
    %c0_10 = arith.constant 0 : index
    %14 = vector.load %arg5[%c0_9, %c0_10] : memref<64x32xbf16, #tpu.memory_space<vmem>>, vector<64x32xbf16>
    %cst_11 = arith.constant dense<0.000000e+00> : vector<16x32xf32>
    %15 = tpu.matmul %13, %14, %cst_11 {dimension_numbers = #tpu.dot_dimension_numbers<[1], [0], [0], [1], [0, 0, 1, 1], [], []>} : vector<16x64xbf16>, vector<64x32xbf16>, vector<16x32xf32> -> vector<16x32xf32>
    %16 = arith.addf %12, %15 : vector<16x32xf32>
    %c0_12 = arith.constant 0 : index
    %c0_13 = arith.constant 0 : index
    %17 = vector.load %arg10[%c0_12, %c0_13] : memref<16x32xf32, #tpu.memory_space<vmem>>, vector<16x32xf32>
    tpu.vector_store %arg10[%c0_12, %c0_13], %16 {strides = array<i32>} : memref<16x32xf32, #tpu.memory_space<vmem>>, vector<16x32xf32>,
    %c0_i32_14 = arith.constant 0 : i32
    %18 = arith.cmpi eq, %arg1, %c0_i32_14 : i32
    %19 = arith.extui %18 : i1 to i32
    %c0_i32_15 = arith.constant 0 : i32
    %20 = arith.cmpi ne, %19, %c0_i32_15 : i32
    scf.if %20 {
      %c0_16 = arith.constant 0 : index
      %c0_17 = arith.constant 0 : index
      %21 = vector.load %arg10[%c0_16, %c0_17] : memref<16x32xf32, #tpu.memory_space<vmem>>, vector<16x32xf32>
      %c0_18 = arith.constant 0 : index
      %c0_19 = arith.constant 0 : index
      %22 = vector.load %arg6[%c0_18, %c0_19] : memref<1x32xf32, #tpu.memory_space<vmem>>, vector<1x32xf32>
      %23 = vector.broadcast %22 : vector<1x32xf32> to vector<16x32xf32>
      %24 = arith.addf %21, %23 : vector<16x32xf32>
      %c0_20 = arith.constant 0 : index
      %c0_21 = arith.constant 0 : index
      %25 = vector.load %arg2[%c0_20, %c0_21] : memref<16x32xf32, #tpu.memory_space<vmem>>, vector<16x32xf32>
      %26 = arith.addf %24, %25 : vector<16x32xf32>
      %cst_22 = arith.constant dense<0.000000e+00> : vector<16xf32>
      %27 = vector.multi_reduction <add>, %26, %cst_22 [1] : vector<16x32xf32> to vector<16xf32>
      %28 = vector.shape_cast %27 : vector<16xf32> to vector<16x1xf32>
      %cst_23 = arith.constant 3.200000e+01 : f32
      %29 = vector.broadcast %cst_23 : f32 to vector<16x1xf32>
      %30 = arith.divf %28, %29 : vector<16x1xf32>
      %31 = vector.broadcast %30 : vector<16x1xf32> to vector<16x32xf32>
      %32 = arith.subf %26, %31 : vector<16x32xf32>
      %33 = arith.mulf %32, %32 : vector<16x32xf32>
      %cst_24 = arith.constant dense<0.000000e+00> : vector<16xf32>
      %34 = vector.multi_reduction <add>, %33, %cst_24 [1] : vector<16x32xf32> to vector<16xf32>
      %35 = vector.shape_cast %34 : vector<16xf32> to vector<16x1xf32>
      %cst_25 = arith.constant 3.200000e+01 : f32
      %36 = vector.broadcast %cst_25 : f32 to vector<16x1xf32>
      %37 = arith.divf %35, %36 : vector<16x1xf32>
      %cst_26 = arith.constant 9.99999974E-6 : f32
      %38 = vector.broadcast %cst_26 : f32 to vector<16x1xf32>
      %39 = arith.addf %37, %38 : vector<16x1xf32>
      %40 = math.rsqrt %39 : vector<16x1xf32>
      %41 = vector.broadcast %40 : vector<16x1xf32> to vector<16x32xf32>
      %42 = arith.mulf %32, %41 : vector<16x32xf32>
      %c0_27 = arith.constant 0 : index
      %c0_28 = arith.constant 0 : index
      %43 = vector.load %arg7[%c0_27, %c0_28] : memref<1x32xf32, #tpu.memory_space<vmem>>, vector<1x32xf32>
      %44 = vector.broadcast %43 : vector<1x32xf32> to vector<16x32xf32>
      %45 = arith.mulf %42, %44 : vector<16x32xf32>
      %c0_29 = arith.constant 0 : index
      %c0_30 = arith.constant 0 : index
      %46 = vector.load %arg8[%c0_29, %c0_30] : memref<1x32xf32, #tpu.memory_space<vmem>>, vector<1x32xf32>
      %47 = vector.broadcast %46 : vector<1x32xf32> to vector<16x32xf32>
      %48 = arith.addf %45, %47 : vector<16x32xf32>
      %c0_31 = arith.constant 0 : index
      %c0_32 = arith.constant 0 : index
      %49 = vector.load %arg9[%c0_31, %c0_32] : memref<16x32xf32, #tpu.memory_space<vmem>>, vector<16x32xf32>
      tpu.vector_store %arg9[%c0_31, %c0_32], %48 {strides = array<i32>} : memref<16x32xf32, #tpu.memory_space<vmem>>, vector<16x32xf32>,
    } else {
    }
    return
  }
  func.func @transform_0(%arg0: i32, %arg1: i32) -> (i32, i32) {
    %c0_i32 = arith.constant 0 : i32
    %c0_i32_0 = arith.constant 0 : i32
    return %arg0, %c0_i32 : i32, i32
  }
  func.func @transform_1(%arg0: i32, %arg1: i32) -> (i32, i32) {
    %c0_i32 = arith.constant 0 : i32
    %c0_i32_0 = arith.constant 0 : i32
    return %c0_i32, %arg1 : i32, i32
  }
  func.func @transform_2(%arg0: i32, %arg1: i32) -> (i32, i32) {
    %c0_i32 = arith.constant 0 : i32
    %c0_i32_0 = arith.constant 0 : i32
    return %c0_i32, %arg1 : i32, i32
  }
  func.func @transform_3(%arg0: i32, %arg1: i32) -> (i32, i32) {
    %c0_i32 = arith.constant 0 : i32
    %c0_i32_0 = arith.constant 0 : i32
    return %arg1, %c0_i32 : i32, i32
  }
  func.func @transform_4(%arg0: i32, %arg1: i32) -> (i32, i32) {
    %c0_i32 = arith.constant 0 : i32
    %c0_i32_0 = arith.constant 0 : i32
    %c0_i32_1 = arith.constant 0 : i32
    return %c0_i32, %c0_i32_0 : i32, i32
  }
  func.func @transform_5(%arg0: i32, %arg1: i32) -> (i32, i32) {
    %c0_i32 = arith.constant 0 : i32
    %c0_i32_0 = arith.constant 0 : i32
    %c0_i32_1 = arith.constant 0 : i32
    return %c0_i32, %c0_i32_0 : i32, i32
  }
  func.func @transform_6(%arg0: i32, %arg1: i32) -> (i32, i32) {
    %c0_i32 = arith.constant 0 : i32
    %c0_i32_0 = arith.constant 0 : i32
    %c0_i32_1 = arith.constant 0 : i32
    return %c0_i32, %c0_i32_0 : i32, i32
  }
  func.func @transform_7(%arg0: i32, %arg1: i32) -> (i32, i32) {
    %c0_i32 = arith.constant 0 : i32
    %c0_i32_0 = arith.constant 0 : i32
    return %arg0, %c0_i32 : i32, i32
  }
}

module attributes {stable_mosaic.version = 11 : i64} {
  func.func @_attn_block_kernel(%arg0: i32, %arg1: memref<1x8x32xf32, #tpu.memory_space<vmem>>, %arg2: memref<32x96xbf16, #tpu.memory_space<vmem>>, %arg3: memref<1x96xf32, #tpu.memory_space<vmem>>, %arg4: memref<32x32xbf16, #tpu.memory_space<vmem>>, %arg5: memref<1x32xf32, #tpu.memory_space<vmem>>, %arg6: memref<1x32xf32, #tpu.memory_space<vmem>>, %arg7: memref<1x32xf32, #tpu.memory_space<vmem>>, %arg8: memref<8x8xf32, #tpu.memory_space<vmem>>, %arg9: memref<1x1x8xf32, #tpu.memory_space<vmem>>, %arg10: memref<1x8x32xf32, #tpu.memory_space<vmem>>) attributes {dimension_semantics = [#tpu.dimension_semantics<parallel>], iteration_bounds = array<i64: 2>, scalar_prefetch = 0 : i64, scratch_operands = 0 : i64, tpu.core_type = #tpu.core_type<tc>, window_params = [{transform_indices = @transform_0, window_bounds = array<i64: 1, 8, 32>}, {pipeline_mode = #tpu.pipeline_mode<synchronous>, transform_indices = @transform_1, window_bounds = array<i64: 32, 96>}, {pipeline_mode = #tpu.pipeline_mode<synchronous>, transform_indices = @transform_2, window_bounds = array<i64: 1, 96>}, {pipeline_mode = #tpu.pipeline_mode<synchronous>, transform_indices = @transform_3, window_bounds = array<i64: 32, 32>}, {pipeline_mode = #tpu.pipeline_mode<synchronous>, transform_indices = @transform_4, window_bounds = array<i64: 1, 32>}, {pipeline_mode = #tpu.pipeline_mode<synchronous>, transform_indices = @transform_5, window_bounds = array<i64: 1, 32>}, {pipeline_mode = #tpu.pipeline_mode<synchronous>, transform_indices = @transform_6, window_bounds = array<i64: 1, 32>}, {pipeline_mode = #tpu.pipeline_mode<synchronous>, transform_indices = @transform_7, window_bounds = array<i64: 8, 8>}, {transform_indices = @transform_8, window_bounds = array<i64: 1, 1, 8>}, {transform_indices = @transform_9, window_bounds = array<i64: 1, 8, 32>}]} {
    %c0 = arith.constant 0 : index
    %c0_0 = arith.constant 0 : index
    %c0_1 = arith.constant 0 : index
    %0 = vector.load %arg1[%c0, %c0_0, %c0_1] : memref<1x8x32xf32, #tpu.memory_space<vmem>>, vector<1x8x32xf32>
    %1 = vector.shape_cast %0 : vector<1x8x32xf32> to vector<8x32xf32>
    %2 = arith.truncf %1 : vector<8x32xf32> to vector<8x32xbf16>
    %c0_2 = arith.constant 0 : index
    %c0_3 = arith.constant 0 : index
    %3 = vector.load %arg2[%c0_2, %c0_3] : memref<32x96xbf16, #tpu.memory_space<vmem>>, vector<32x96xbf16>
    %cst = arith.constant dense<0.000000e+00> : vector<8x96xf32>
    %4 = tpu.matmul %2, %3, %cst {dimension_numbers = #tpu.dot_dimension_numbers<[1], [0], [0], [1], [0, 0, 1, 1], [], []>} : vector<8x32xbf16>, vector<32x96xbf16>, vector<8x96xf32> -> vector<8x96xf32>
    %c0_4 = arith.constant 0 : index
    %c0_5 = arith.constant 0 : index
    %5 = vector.load %arg3[%c0_4, %c0_5] : memref<1x96xf32, #tpu.memory_space<vmem>>, vector<1x96xf32>
    %6 = vector.broadcast %5 : vector<1x96xf32> to vector<8x96xf32>
    %7 = arith.addf %4, %6 : vector<8x96xf32>
    %c0_6 = arith.constant 0 : index
    %c0_7 = arith.constant 0 : index
    %8 = vector.load %arg8[%c0_6, %c0_7] : memref<8x8xf32, #tpu.memory_space<vmem>>, vector<8x8xf32>
    %c0_8 = arith.constant 0 : index
    %c0_9 = arith.constant 0 : index
    %c0_10 = arith.constant 0 : index
    %9 = vector.load %arg9[%c0_8, %c0_9, %c0_10] : memref<1x1x8xf32, #tpu.memory_space<vmem>>, vector<1x1x8xf32>
    %10 = vector.shape_cast %9 : vector<1x1x8xf32> to vector<1x8xf32>
    %11 = vector.broadcast %10 : vector<1x8xf32> to vector<8x8xf32>
    %12 = arith.addf %8, %11 : vector<8x8xf32>
    %13 = vector.extract_strided_slice %7 {offsets = [0, 0], sizes = [8, 8], strides = [1, 1]} : vector<8x96xf32> to vector<8x8xf32>
    %14 = vector.extract_strided_slice %7 {offsets = [0, 32], sizes = [8, 8], strides = [1, 1]} : vector<8x96xf32> to vector<8x8xf32>
    %15 = vector.extract_strided_slice %7 {offsets = [0, 64], sizes = [8, 8], strides = [1, 1]} : vector<8x96xf32> to vector<8x8xf32>
    %16 = arith.truncf %13 : vector<8x8xf32> to vector<8x8xbf16>
    %17 = arith.truncf %14 : vector<8x8xf32> to vector<8x8xbf16>
    %cst_11 = arith.constant dense<0.000000e+00> : vector<8x8xf32>
    %18 = tpu.matmul %16, %17, %cst_11 {dimension_numbers = #tpu.dot_dimension_numbers<[1], [1], [0], [0], [0, 0, 1, 0], [], []>} : vector<8x8xbf16>, vector<8x8xbf16>, vector<8x8xf32> -> vector<8x8xf32>
    %cst_12 = arith.constant 0.353553385 : f32
    %19 = vector.broadcast %cst_12 : f32 to vector<8x8xf32>
    %20 = arith.mulf %18, %19 : vector<8x8xf32>
    %21 = arith.addf %20, %12 : vector<8x8xf32>
    %cst_13 = arith.constant dense<0xFF800000> : vector<8xf32>
    %22 = vector.multi_reduction <maximumf>, %21, %cst_13 [1] : vector<8x8xf32> to vector<8xf32>
    %23 = vector.shape_cast %22 : vector<8xf32> to vector<8x1xf32>
    %24 = vector.broadcast %23 : vector<8x1xf32> to vector<8x8xf32>
    %25 = arith.subf %21, %24 : vector<8x8xf32>
    %26 = math.exp %25 : vector<8x8xf32>
    %cst_14 = arith.constant dense<0.000000e+00> : vector<8xf32>
    %27 = vector.multi_reduction <add>, %26, %cst_14 [1] : vector<8x8xf32> to vector<8xf32>
    %28 = vector.shape_cast %27 : vector<8xf32> to vector<8x1xf32>
    %29 = arith.truncf %26 : vector<8x8xf32> to vector<8x8xbf16>
    %30 = arith.truncf %15 : vector<8x8xf32> to vector<8x8xbf16>
    %cst_15 = arith.constant dense<0.000000e+00> : vector<8x8xf32>
    %31 = tpu.matmul %29, %30, %cst_15 {dimension_numbers = #tpu.dot_dimension_numbers<[1], [0], [0], [1], [0, 0, 1, 1], [], []>} : vector<8x8xbf16>, vector<8x8xbf16>, vector<8x8xf32> -> vector<8x8xf32>
    %32 = tpu.reciprocal %28 {approx = true} : vector<8x1xf32> -> vector<8x1xf32>
    %33 = vector.broadcast %32 : vector<8x1xf32> to vector<8x8xf32>
    %34 = arith.mulf %31, %33 : vector<8x8xf32>
    %35 = vector.extract_strided_slice %7 {offsets = [0, 8], sizes = [8, 8], strides = [1, 1]} : vector<8x96xf32> to vector<8x8xf32>
    %36 = vector.extract_strided_slice %7 {offsets = [0, 40], sizes = [8, 8], strides = [1, 1]} : vector<8x96xf32> to vector<8x8xf32>
    %37 = vector.extract_strided_slice %7 {offsets = [0, 72], sizes = [8, 8], strides = [1, 1]} : vector<8x96xf32> to vector<8x8xf32>
    %38 = arith.truncf %35 : vector<8x8xf32> to vector<8x8xbf16>
    %39 = arith.truncf %36 : vector<8x8xf32> to vector<8x8xbf16>
    %cst_16 = arith.constant dense<0.000000e+00> : vector<8x8xf32>
    %40 = tpu.matmul %38, %39, %cst_16 {dimension_numbers = #tpu.dot_dimension_numbers<[1], [1], [0], [0], [0, 0, 1, 0], [], []>} : vector<8x8xbf16>, vector<8x8xbf16>, vector<8x8xf32> -> vector<8x8xf32>
    %cst_17 = arith.constant 0.353553385 : f32
    %41 = vector.broadcast %cst_17 : f32 to vector<8x8xf32>
    %42 = arith.mulf %40, %41 : vector<8x8xf32>
    %43 = arith.addf %42, %12 : vector<8x8xf32>
    %cst_18 = arith.constant dense<0xFF800000> : vector<8xf32>
    %44 = vector.multi_reduction <maximumf>, %43, %cst_18 [1] : vector<8x8xf32> to vector<8xf32>
    %45 = vector.shape_cast %44 : vector<8xf32> to vector<8x1xf32>
    %46 = vector.broadcast %45 : vector<8x1xf32> to vector<8x8xf32>
    %47 = arith.subf %43, %46 : vector<8x8xf32>
    %48 = math.exp %47 : vector<8x8xf32>
    %cst_19 = arith.constant dense<0.000000e+00> : vector<8xf32>
    %49 = vector.multi_reduction <add>, %48, %cst_19 [1] : vector<8x8xf32> to vector<8xf32>
    %50 = vector.shape_cast %49 : vector<8xf32> to vector<8x1xf32>
    %51 = arith.truncf %48 : vector<8x8xf32> to vector<8x8xbf16>
    %52 = arith.truncf %37 : vector<8x8xf32> to vector<8x8xbf16>
    %cst_20 = arith.constant dense<0.000000e+00> : vector<8x8xf32>
    %53 = tpu.matmul %51, %52, %cst_20 {dimension_numbers = #tpu.dot_dimension_numbers<[1], [0], [0], [1], [0, 0, 1, 1], [], []>} : vector<8x8xbf16>, vector<8x8xbf16>, vector<8x8xf32> -> vector<8x8xf32>
    %54 = tpu.reciprocal %50 {approx = true} : vector<8x1xf32> -> vector<8x1xf32>
    %55 = vector.broadcast %54 : vector<8x1xf32> to vector<8x8xf32>
    %56 = arith.mulf %53, %55 : vector<8x8xf32>
    %57 = vector.extract_strided_slice %7 {offsets = [0, 16], sizes = [8, 8], strides = [1, 1]} : vector<8x96xf32> to vector<8x8xf32>
    %58 = vector.extract_strided_slice %7 {offsets = [0, 48], sizes = [8, 8], strides = [1, 1]} : vector<8x96xf32> to vector<8x8xf32>
    %59 = vector.extract_strided_slice %7 {offsets = [0, 80], sizes = [8, 8], strides = [1, 1]} : vector<8x96xf32> to vector<8x8xf32>
    %60 = arith.truncf %57 : vector<8x8xf32> to vector<8x8xbf16>
    %61 = arith.truncf %58 : vector<8x8xf32> to vector<8x8xbf16>
    %cst_21 = arith.constant dense<0.000000e+00> : vector<8x8xf32>
    %62 = tpu.matmul %60, %61, %cst_21 {dimension_numbers = #tpu.dot_dimension_numbers<[1], [1], [0], [0], [0, 0, 1, 0], [], []>} : vector<8x8xbf16>, vector<8x8xbf16>, vector<8x8xf32> -> vector<8x8xf32>
    %cst_22 = arith.constant 0.353553385 : f32
    %63 = vector.broadcast %cst_22 : f32 to vector<8x8xf32>
    %64 = arith.mulf %62, %63 : vector<8x8xf32>
    %65 = arith.addf %64, %12 : vector<8x8xf32>
    %cst_23 = arith.constant dense<0xFF800000> : vector<8xf32>
    %66 = vector.multi_reduction <maximumf>, %65, %cst_23 [1] : vector<8x8xf32> to vector<8xf32>
    %67 = vector.shape_cast %66 : vector<8xf32> to vector<8x1xf32>
    %68 = vector.broadcast %67 : vector<8x1xf32> to vector<8x8xf32>
    %69 = arith.subf %65, %68 : vector<8x8xf32>
    %70 = math.exp %69 : vector<8x8xf32>
    %cst_24 = arith.constant dense<0.000000e+00> : vector<8xf32>
    %71 = vector.multi_reduction <add>, %70, %cst_24 [1] : vector<8x8xf32> to vector<8xf32>
    %72 = vector.shape_cast %71 : vector<8xf32> to vector<8x1xf32>
    %73 = arith.truncf %70 : vector<8x8xf32> to vector<8x8xbf16>
    %74 = arith.truncf %59 : vector<8x8xf32> to vector<8x8xbf16>
    %cst_25 = arith.constant dense<0.000000e+00> : vector<8x8xf32>
    %75 = tpu.matmul %73, %74, %cst_25 {dimension_numbers = #tpu.dot_dimension_numbers<[1], [0], [0], [1], [0, 0, 1, 1], [], []>} : vector<8x8xbf16>, vector<8x8xbf16>, vector<8x8xf32> -> vector<8x8xf32>
    %76 = tpu.reciprocal %72 {approx = true} : vector<8x1xf32> -> vector<8x1xf32>
    %77 = vector.broadcast %76 : vector<8x1xf32> to vector<8x8xf32>
    %78 = arith.mulf %75, %77 : vector<8x8xf32>
    %79 = vector.extract_strided_slice %7 {offsets = [0, 24], sizes = [8, 8], strides = [1, 1]} : vector<8x96xf32> to vector<8x8xf32>
    %80 = vector.extract_strided_slice %7 {offsets = [0, 56], sizes = [8, 8], strides = [1, 1]} : vector<8x96xf32> to vector<8x8xf32>
    %81 = vector.extract_strided_slice %7 {offsets = [0, 88], sizes = [8, 8], strides = [1, 1]} : vector<8x96xf32> to vector<8x8xf32>
    %82 = arith.truncf %79 : vector<8x8xf32> to vector<8x8xbf16>
    %83 = arith.truncf %80 : vector<8x8xf32> to vector<8x8xbf16>
    %cst_26 = arith.constant dense<0.000000e+00> : vector<8x8xf32>
    %84 = tpu.matmul %82, %83, %cst_26 {dimension_numbers = #tpu.dot_dimension_numbers<[1], [1], [0], [0], [0, 0, 1, 0], [], []>} : vector<8x8xbf16>, vector<8x8xbf16>, vector<8x8xf32> -> vector<8x8xf32>
    %cst_27 = arith.constant 0.353553385 : f32
    %85 = vector.broadcast %cst_27 : f32 to vector<8x8xf32>
    %86 = arith.mulf %84, %85 : vector<8x8xf32>
    %87 = arith.addf %86, %12 : vector<8x8xf32>
    %cst_28 = arith.constant dense<0xFF800000> : vector<8xf32>
    %88 = vector.multi_reduction <maximumf>, %87, %cst_28 [1] : vector<8x8xf32> to vector<8xf32>
    %89 = vector.shape_cast %88 : vector<8xf32> to vector<8x1xf32>
    %90 = vector.broadcast %89 : vector<8x1xf32> to vector<8x8xf32>
    %91 = arith.subf %87, %90 : vector<8x8xf32>
    %92 = math.exp %91 : vector<8x8xf32>
    %cst_29 = arith.constant dense<0.000000e+00> : vector<8xf32>
    %93 = vector.multi_reduction <add>, %92, %cst_29 [1] : vector<8x8xf32> to vector<8xf32>
    %94 = vector.shape_cast %93 : vector<8xf32> to vector<8x1xf32>
    %95 = arith.truncf %92 : vector<8x8xf32> to vector<8x8xbf16>
    %96 = arith.truncf %81 : vector<8x8xf32> to vector<8x8xbf16>
    %cst_30 = arith.constant dense<0.000000e+00> : vector<8x8xf32>
    %97 = tpu.matmul %95, %96, %cst_30 {dimension_numbers = #tpu.dot_dimension_numbers<[1], [0], [0], [1], [0, 0, 1, 1], [], []>} : vector<8x8xbf16>, vector<8x8xbf16>, vector<8x8xf32> -> vector<8x8xf32>
    %98 = tpu.reciprocal %94 {approx = true} : vector<8x1xf32> -> vector<8x1xf32>
    %99 = vector.broadcast %98 : vector<8x1xf32> to vector<8x8xf32>
    %100 = arith.mulf %97, %99 : vector<8x8xf32>
    %101 = tpu.concatenate %34, %56, %78, %100 in 1 : vector<8x8xf32>, vector<8x8xf32>, vector<8x8xf32>, vector<8x8xf32> -> vector<8x32xf32>
    %102 = arith.truncf %101 : vector<8x32xf32> to vector<8x32xbf16>
    %c0_31 = arith.constant 0 : index
    %c0_32 = arith.constant 0 : index
    %103 = vector.load %arg4[%c0_31, %c0_32] : memref<32x32xbf16, #tpu.memory_space<vmem>>, vector<32x32xbf16>
    %cst_33 = arith.constant dense<0.000000e+00> : vector<8x32xf32>
    %104 = tpu.matmul %102, %103, %cst_33 {dimension_numbers = #tpu.dot_dimension_numbers<[1], [0], [0], [1], [0, 0, 1, 1], [], []>} : vector<8x32xbf16>, vector<32x32xbf16>, vector<8x32xf32> -> vector<8x32xf32>
    %c0_34 = arith.constant 0 : index
    %c0_35 = arith.constant 0 : index
    %105 = vector.load %arg5[%c0_34, %c0_35] : memref<1x32xf32, #tpu.memory_space<vmem>>, vector<1x32xf32>
    %106 = vector.broadcast %105 : vector<1x32xf32> to vector<8x32xf32>
    %107 = arith.addf %104, %106 : vector<8x32xf32>
    %108 = arith.addf %107, %1 : vector<8x32xf32>
    %cst_36 = arith.constant dense<0.000000e+00> : vector<8xf32>
    %109 = vector.multi_reduction <add>, %108, %cst_36 [1] : vector<8x32xf32> to vector<8xf32>
    %110 = vector.shape_cast %109 : vector<8xf32> to vector<8x1xf32>
    %cst_37 = arith.constant 3.200000e+01 : f32
    %111 = vector.broadcast %cst_37 : f32 to vector<8x1xf32>
    %112 = arith.divf %110, %111 : vector<8x1xf32>
    %113 = vector.broadcast %112 : vector<8x1xf32> to vector<8x32xf32>
    %114 = arith.subf %108, %113 : vector<8x32xf32>
    %115 = arith.mulf %114, %114 : vector<8x32xf32>
    %cst_38 = arith.constant dense<0.000000e+00> : vector<8xf32>
    %116 = vector.multi_reduction <add>, %115, %cst_38 [1] : vector<8x32xf32> to vector<8xf32>
    %117 = vector.shape_cast %116 : vector<8xf32> to vector<8x1xf32>
    %cst_39 = arith.constant 3.200000e+01 : f32
    %118 = vector.broadcast %cst_39 : f32 to vector<8x1xf32>
    %119 = arith.divf %117, %118 : vector<8x1xf32>
    %cst_40 = arith.constant 9.99999974E-6 : f32
    %120 = vector.broadcast %cst_40 : f32 to vector<8x1xf32>
    %121 = arith.addf %119, %120 : vector<8x1xf32>
    %122 = math.rsqrt %121 : vector<8x1xf32>
    %123 = vector.broadcast %122 : vector<8x1xf32> to vector<8x32xf32>
    %124 = arith.mulf %114, %123 : vector<8x32xf32>
    %c0_41 = arith.constant 0 : index
    %c0_42 = arith.constant 0 : index
    %125 = vector.load %arg6[%c0_41, %c0_42] : memref<1x32xf32, #tpu.memory_space<vmem>>, vector<1x32xf32>
    %126 = vector.broadcast %125 : vector<1x32xf32> to vector<8x32xf32>
    %127 = arith.mulf %124, %126 : vector<8x32xf32>
    %c0_43 = arith.constant 0 : index
    %c0_44 = arith.constant 0 : index
    %128 = vector.load %arg7[%c0_43, %c0_44] : memref<1x32xf32, #tpu.memory_space<vmem>>, vector<1x32xf32>
    %129 = vector.broadcast %128 : vector<1x32xf32> to vector<8x32xf32>
    %130 = arith.addf %127, %129 : vector<8x32xf32>
    %c0_45 = arith.constant 0 : index
    %c0_46 = arith.constant 0 : index
    %c0_47 = arith.constant 0 : index
    %131 = vector.load %arg10[%c0_45, %c0_46, %c0_47] : memref<1x8x32xf32, #tpu.memory_space<vmem>>, vector<1x8x32xf32>
    %132 = vector.shape_cast %131 : vector<1x8x32xf32> to vector<8x32xf32>
    %133 = vector.shape_cast %130 : vector<8x32xf32> to vector<1x8x32xf32>
    tpu.vector_store %arg10[%c0_45, %c0_46, %c0_47], %133 {strides = array<i32>} : memref<1x8x32xf32, #tpu.memory_space<vmem>>, vector<1x8x32xf32>,
    return
  }
  func.func @transform_0(%arg0: i32) -> (i32, i32, i32) {
    %c0_i32 = arith.constant 0 : i32
    %c0_i32_0 = arith.constant 0 : i32
    %c0_i32_1 = arith.constant 0 : i32
    return %arg0, %c0_i32, %c0_i32_0 : i32, i32, i32
  }
  func.func @transform_1(%arg0: i32) -> (i32, i32) {
    %c0_i32 = arith.constant 0 : i32
    %c0_i32_0 = arith.constant 0 : i32
    %c0_i32_1 = arith.constant 0 : i32
    return %c0_i32, %c0_i32_0 : i32, i32
  }
  func.func @transform_2(%arg0: i32) -> (i32, i32) {
    %c0_i32 = arith.constant 0 : i32
    %c0_i32_0 = arith.constant 0 : i32
    %c0_i32_1 = arith.constant 0 : i32
    return %c0_i32, %c0_i32_0 : i32, i32
  }
  func.func @transform_3(%arg0: i32) -> (i32, i32) {
    %c0_i32 = arith.constant 0 : i32
    %c0_i32_0 = arith.constant 0 : i32
    %c0_i32_1 = arith.constant 0 : i32
    return %c0_i32, %c0_i32_0 : i32, i32
  }
  func.func @transform_4(%arg0: i32) -> (i32, i32) {
    %c0_i32 = arith.constant 0 : i32
    %c0_i32_0 = arith.constant 0 : i32
    %c0_i32_1 = arith.constant 0 : i32
    return %c0_i32, %c0_i32_0 : i32, i32
  }
  func.func @transform_5(%arg0: i32) -> (i32, i32) {
    %c0_i32 = arith.constant 0 : i32
    %c0_i32_0 = arith.constant 0 : i32
    %c0_i32_1 = arith.constant 0 : i32
    return %c0_i32, %c0_i32_0 : i32, i32
  }
  func.func @transform_6(%arg0: i32) -> (i32, i32) {
    %c0_i32 = arith.constant 0 : i32
    %c0_i32_0 = arith.constant 0 : i32
    %c0_i32_1 = arith.constant 0 : i32
    return %c0_i32, %c0_i32_0 : i32, i32
  }
  func.func @transform_7(%arg0: i32) -> (i32, i32) {
    %c0_i32 = arith.constant 0 : i32
    %c0_i32_0 = arith.constant 0 : i32
    %c0_i32_1 = arith.constant 0 : i32
    return %c0_i32, %c0_i32_0 : i32, i32
  }
  func.func @transform_8(%arg0: i32) -> (i32, i32, i32) {
    %c0_i32 = arith.constant 0 : i32
    %c0_i32_0 = arith.constant 0 : i32
    %c0_i32_1 = arith.constant 0 : i32
    return %arg0, %c0_i32, %c0_i32_0 : i32, i32, i32
  }
  func.func @transform_9(%arg0: i32) -> (i32, i32, i32) {
    %c0_i32 = arith.constant 0 : i32
    %c0_i32_0 = arith.constant 0 : i32
    %c0_i32_1 = arith.constant 0 : i32
    return %arg0, %c0_i32, %c0_i32_0 : i32, i32, i32
  }
}

module attributes {stable_mosaic.version = 11 : i64} {
  func.func @_ln_kernel(%arg0: i32, %arg1: memref<16x32xf32, #tpu.memory_space<vmem>>, %arg2: memref<1x32xf32, #tpu.memory_space<vmem>>, %arg3: memref<1x32xf32, #tpu.memory_space<vmem>>, %arg4: memref<16x32xf32, #tpu.memory_space<vmem>>) attributes {dimension_semantics = [#tpu.dimension_semantics<parallel>], iteration_bounds = array<i64: 1>, scalar_prefetch = 0 : i64, scratch_operands = 0 : i64, tpu.core_type = #tpu.core_type<tc>, window_params = [{transform_indices = @transform_0, window_bounds = array<i64: 16, 32>}, {pipeline_mode = #tpu.pipeline_mode<synchronous>, transform_indices = @transform_1, window_bounds = array<i64: 1, 32>}, {pipeline_mode = #tpu.pipeline_mode<synchronous>, transform_indices = @transform_2, window_bounds = array<i64: 1, 32>}, {transform_indices = @transform_3, window_bounds = array<i64: 16, 32>}]} {
    %c0 = arith.constant 0 : index
    %c0_0 = arith.constant 0 : index
    %0 = vector.load %arg1[%c0, %c0_0] : memref<16x32xf32, #tpu.memory_space<vmem>>, vector<16x32xf32>
    %cst = arith.constant dense<0.000000e+00> : vector<16xf32>
    %1 = vector.multi_reduction <add>, %0, %cst [1] : vector<16x32xf32> to vector<16xf32>
    %2 = vector.shape_cast %1 : vector<16xf32> to vector<16x1xf32>
    %cst_1 = arith.constant 3.200000e+01 : f32
    %3 = vector.broadcast %cst_1 : f32 to vector<16x1xf32>
    %4 = arith.divf %2, %3 : vector<16x1xf32>
    %5 = vector.broadcast %4 : vector<16x1xf32> to vector<16x32xf32>
    %6 = arith.subf %0, %5 : vector<16x32xf32>
    %7 = arith.mulf %6, %6 : vector<16x32xf32>
    %cst_2 = arith.constant dense<0.000000e+00> : vector<16xf32>
    %8 = vector.multi_reduction <add>, %7, %cst_2 [1] : vector<16x32xf32> to vector<16xf32>
    %9 = vector.shape_cast %8 : vector<16xf32> to vector<16x1xf32>
    %cst_3 = arith.constant 3.200000e+01 : f32
    %10 = vector.broadcast %cst_3 : f32 to vector<16x1xf32>
    %11 = arith.divf %9, %10 : vector<16x1xf32>
    %cst_4 = arith.constant 9.99999974E-6 : f32
    %12 = vector.broadcast %cst_4 : f32 to vector<16x1xf32>
    %13 = arith.addf %11, %12 : vector<16x1xf32>
    %14 = math.rsqrt %13 : vector<16x1xf32>
    %15 = vector.broadcast %14 : vector<16x1xf32> to vector<16x32xf32>
    %16 = arith.mulf %6, %15 : vector<16x32xf32>
    %c0_5 = arith.constant 0 : index
    %c0_6 = arith.constant 0 : index
    %17 = vector.load %arg2[%c0_5, %c0_6] : memref<1x32xf32, #tpu.memory_space<vmem>>, vector<1x32xf32>
    %18 = vector.broadcast %17 : vector<1x32xf32> to vector<16x32xf32>
    %19 = arith.mulf %16, %18 : vector<16x32xf32>
    %c0_7 = arith.constant 0 : index
    %c0_8 = arith.constant 0 : index
    %20 = vector.load %arg3[%c0_7, %c0_8] : memref<1x32xf32, #tpu.memory_space<vmem>>, vector<1x32xf32>
    %21 = vector.broadcast %20 : vector<1x32xf32> to vector<16x32xf32>
    %22 = arith.addf %19, %21 : vector<16x32xf32>
    %c0_9 = arith.constant 0 : index
    %c0_10 = arith.constant 0 : index
    %23 = vector.load %arg4[%c0_9, %c0_10] : memref<16x32xf32, #tpu.memory_space<vmem>>, vector<16x32xf32>
    tpu.vector_store %arg4[%c0_9, %c0_10], %22 {strides = array<i32>} : memref<16x32xf32, #tpu.memory_space<vmem>>, vector<16x32xf32>,
    return
  }
  func.func @transform_0(%arg0: i32) -> (i32, i32) {
    %c0_i32 = arith.constant 0 : i32
    %c0_i32_0 = arith.constant 0 : i32
    return %arg0, %c0_i32 : i32, i32
  }
  func.func @transform_1(%arg0: i32) -> (i32, i32) {
    %c0_i32 = arith.constant 0 : i32
    %c0_i32_0 = arith.constant 0 : i32
    %c0_i32_1 = arith.constant 0 : i32
    return %c0_i32, %c0_i32_0 : i32, i32
  }
  func.func @transform_2(%arg0: i32) -> (i32, i32) {
    %c0_i32 = arith.constant 0 : i32
    %c0_i32_0 = arith.constant 0 : i32
    %c0_i32_1 = arith.constant 0 : i32
    return %c0_i32, %c0_i32_0 : i32, i32
  }
  func.func @transform_3(%arg0: i32) -> (i32, i32) {
    %c0_i32 = arith.constant 0 : i32
    %c0_i32_0 = arith.constant 0 : i32
    return %arg0, %c0_i32 : i32, i32
  }
}

</mosaic_0001>

<bundles_post_ra>
// kernel: transformer_encoder_rpr.9
= control target key start
LH: loop header
LB: loop body
LE: loop exit
PB: predicated region body
PF: predicated region fallthrough
CT: control target
= control target key end

     0   :  { %vm16_vm0 = vcmask 261120   ;;  %s118_s0 = inlined_call_operand.vmem [shape: f32[16,32], index: 0, kind: input, shape index: {}]   ;;  %s119_s1 = inlined_call_operand.vmem [shape: f32[1,32], index: 1, kind: input, shape index: {}]   ;;  %s120_s2 = inlined_call_operand.vmem [shape: f32[1,32], index: 2, kind: input, shape index: {}]   ;;  %s121_s3 = inlined_call_operand.vmem [shape: f32[16,32], index: 3, kind: output, shape index: {}]  }
   0x1   :  { %v14_v0 = vld [vmem:[%s118_s0] sm:$0xff]  ;;  %v15_v1 = vld [vmem:[%s118_s0 + $0x8] sm:$0xff] }
   0x2   :  { %v17_v2 = vsel %vm16_vm0, %v14_v0, 0.0  ;;  %v20_v3 = vsel %vm16_vm0, %v15_v1, 0.0  ;;  %v68_v21 = vld [vmem:[%s119_s1] ss:$0 sm:$0xff] }
   0x3   :  { %18 = vadd.xlane.f32.xlu0 %v17_v2  ;;  %v69_v23 = vld [vmem:[%s120_s2] ss:$0 sm:$0xff] }
   0x7   :  { %21 = vadd.xlane.f32.xlu0 %v20_v3 }
  0x8c   :  { %v19_v4 = vpop.xlane.xlu0 %18 }
  0x8d   :  { %v24_v5 = vmul.f32 0.03125, %v19_v4 }
  0x8f   :  { %v26_v6 = vsub.f32 %v14_v0, %v24_v5 }
  0x90   :  { %v22_v7 = vpop.xlane.xlu0 %21 }
  0x91   :  { %v25_v8 = vmul.f32 0.03125, %v22_v7  ;;  %v28_v9 = vmul.f32 %v26_v6, %v26_v6 }
  0x93   :  { %v27_v10 = vsub.f32 %v15_v1, %v25_v8  ;;  %v30_v11 = vsel %vm16_vm0, %v28_v9, 0.0 }
  0x94   :  { %31 = vadd.xlane.f32.xlu1 %v30_v11 }
  0x95   :  { %v29_v12 = vmul.f32 %v27_v10, %v27_v10 }
  0x97   :  { %v33_v13 = vsel %vm16_vm0, %v29_v12, 0.0 }
  0x98   :  { %34 = vadd.xlane.f32.xlu1 %v33_v13 }
 0x11d   :  { %v32_v14 = vpop.xlane.xlu1 %31 }
 0x11e   :  { %v36_v15 = vmul.f32 0.03125, %v32_v14 }
 0x120   :  { %v38_v16 = vadd.f32 1e-05, %v36_v15 }
 0x121   :  { %v35_v17 = vpop.xlane.xlu1 %34 }
 0x122   :  { %70 = vrsqrt.f32 %v38_v16  ;;  %v37_v18 = vmul.f32 0.03125, %v35_v17 }
 0x124   :  { %v39_v19 = vadd.f32 1e-05, %v37_v18 }
 0x126   :  { %72 = vrsqrt.f32 %v39_v19 }
 0x12f   :  { %v71_v20 = vpop.eup %70 }
 0x130   :  { %v42_v22 = vmul.f32 %v71_v20, %v26_v6 }
 0x132   :  { %v51_v24 = vmul.f32 %v68_v21, %v42_v22 }
 0x133   :  { %v73_v25 = vpop.eup %72 }
 0x134   :  { %v60_v26 = vadd.f32 %v69_v23, %v51_v24  ;;  %v43_v27 = vmul.f32 %v73_v25, %v27_v10 }
 0x136   :  { %62 = vst.msk [vmem:[%s121_s3] sm:$0xff] %vm16_vm0, %v60_v26  ;;  %v52_v28 = vmul.f32 %v68_v21, %v43_v27 }
 0x138   :  { %v61_v29 = vadd.f32 %v69_v23, %v52_v28 }
 0x13a   :  { %63 = vst.msk [vmem:[%s121_s3 + $0x8] sm:$0xff] %vm16_vm0, %v61_v29 }

// kernel: transformer_encoder_rpr.6
= control target key start
LH: loop header
LB: loop body
LE: loop exit
PB: predicated region body
PF: predicated region fallthrough
CT: control target
= control target key end

     0   :  { %vm31_vm0 = vcmask 261120   ;;  %v312_v0 = vmov 0.0   ;;  %vm313_vm1 = vmmov 0   ;;  %vm142_vm2 = vcmask 523264   ;;  %s407_s1 = inlined_call_operand.vmem [shape: bf16[32,64], index: 1, kind: input, shape index: {}]   ;;  %s408_s0 = inlined_call_operand.vmem [shape: f32[16,32], index: 0, kind: input, shape index: {}]   ;;  %s409_s3 = inlined_call_operand.vmem [shape: bf16[64,32], index: 3, kind: input, shape index: {}]   ;;  %s410_s2 = inlined_call_operand.vmem [shape: f32[1,64], index: 2, kind: input, shape index: {}]   ;;  %s411_s4 = inlined_call_operand.vmem [shape: f32[1,32], index: 4, kind: input, shape index: {}]   ;;  %s412_s5 = inlined_call_operand.vmem [shape: f32[1,32], index: 5, kind: input, shape index: {}]   ;;  %s413_s6 = inlined_call_operand.vmem [shape: f32[1,32], index: 6, kind: input, shape index: {}]   ;;  %s414_s7 = inlined_call_operand.vmem [shape: f32[16,32], index: 7, kind: output, shape index: {}]  }
   0x1   :  { %280 = vmatprep.subr.bf16.mxu0 %v312_v0  ;;  %v302_v1 = vld [vmem:[%s407_s1 + $0x8] sm:$0xff]   ;;  %284 = vmatprep.mubr.msk.bf16.mxu0 %vm313_vm1, %v312_v0  ;;  %32 = vst.msk [vmem:[#allocation2] sm:$0xff] %vm31_vm0, %v312_v0  ;;  %33 = vst.msk [vmem:[#allocation2 + $0x8] sm:$0xff] %vm31_vm0, %v312_v0  ;;  %v303_v2 = vld [vmem:[%s407_s1] sm:$0xff]  }
   0x2   :  { %288 = vmatprep.subr.bf16.mxu1 %v312_v0  ;;  %296 = vmatprep.mubr.msk.bf16.mxu1 %vm313_vm1, %v312_v0  ;;  %v34_v3 = vld [vmem:[%s408_s0] sm:$0xff]  ;;  %v35_v4 = vld [vmem:[%s408_s0 + $0x8] sm:$0xff]  ;;  %v304_v5 = vld [vmem:[%s409_s3 + $0x18] sm:$0xff]  }
   0x3   :  { %281 = vmatpush3.bf16.msra.mxu0 %v302_v1  ;;  %v36_v6 = vpack.c.bf16 %v35_v4, %v34_v3  ;;  %289 = vmatpush3.bf16.msra.mxu1 %v304_v5  ;;  %v305_v7 = vld [vmem:[%s409_s3 + $0x10] sm:$0xff]   ;;  %v306_v8 = vld [vmem:[%s409_s3 + $0x8] sm:$0xff]   ;;  %v307_v9 = vld [vmem:[%s409_s3] sm:$0xff]  }
   0x4   :  { %282 = vmatprep.subr.bf16.mxu0 %v312_v0  ;;  %290 = vmatprep.subr.bf16.mxu1 %v312_v0  ;;  %v260_v10 = vld [vmem:[%s410_s2] ss:$0 sm:$0xff] }
   0x5   :  { %v269_v28 = vld [vmem:[%s411_s4] ss:$0 sm:$0xff] }
   0x6   :  { %v270_v54 = vld [vmem:[%s412_s5] ss:$0 sm:$0xff] }
   0x7   :  { %283 = vmatpush3.bf16.msra.mxu0 %v303_v2  ;;  %291 = vmatpush3.bf16.msra.mxu1 %v305_v7  ;;  %v271_v56 = vld [vmem:[%s413_s6] ss:$0 sm:$0xff] }
   0x8   :  { %292 = vmatprep.subr.bf16.mxu1 %v312_v0  ;;  %v107_v20 = vld [vmem:[#allocation2] sm:$0xff]  ;;  %v108_v24 = vld [vmem:[#allocation2 + $0x8] sm:$0xff] }
   0xa   :  { %285 = vmatmul.mubr.msk.bf16.vlgmr.msra.gmra.mxu0 %vm31_vm0, %v36_v6 }
   0xb   :  { %293 = vmatpush3.bf16.msra.mxu1 %v306_v8 }
   0xc   :  { %294 = vmatprep.subr.bf16.mxu1 %v312_v0 }
   0xf   :  { %295 = vmatpush3.bf16.msra.mxu1 %v307_v9 }
  0xca   :  { %v98_v11 = vpop.f32.mrf.mxu0 }
  0xcb   :  { %v99_v13 = vadd.f32 %v260_v10, %v98_v11 }
  0xcc   :  { %v286_v12 = vpop.f32.mrf.mxu0 }
  0xcd   :  { %v105_v17 = vmax.f32 %v99_v13, 0.0 }
  0xce   :  { %v101_v14 = vpop.f32.mrf.mxu0 }
  0xcf   :  { %v102_v15 = vadd.f32 %v260_v10, %v101_v14 }
  0xd0   :  { %v287_v16 = vpop.f32.mrf.mxu0 }
  0xd1   :  { %v106_v18 = vmax.f32 %v102_v15, 0.0 }
  0xd3   :  { %v109_v19 = vpack.c.bf16 %v106_v18, %v105_v17 }
  0xd5   :  { %297 = vmatmul.mubr.msk.bf16.vlgmr.msra.gmra.mxu1 %vm142_vm2, %v109_v19 }
 0x195   :  { %v180_v21 = vpop.f32.mrf.mxu1 }
 0x196   :  { %v187_v22 = vadd.f32 %v180_v21, %v107_v20 }
 0x197   :  { %v298_v23 = vpop.f32.mrf.mxu1 }
 0x198   :  { %189 = vst.msk [vmem:[#allocation2] sm:$0xff] %vm31_vm0, %v187_v22 }
 0x199   :  { %v183_v25 = vpop.f32.mrf.mxu1 }
 0x19a   :  { %v188_v26 = vadd.f32 %v183_v25, %v108_v24 }
 0x19b   :  { %v299_v27 = vpop.f32.mrf.mxu1 }
 0x19c   :  { %190 = vst.msk [vmem:[#allocation2 + $0x8] sm:$0xff] %vm31_vm0, %v188_v26 }
 0x19f   :  { %v194_v29 = vld [vmem:[#allocation2] sm:$0xff] }
 0x1a0   :  { %v203_v30 = vadd.f32 %v269_v28, %v194_v29 }
 0x1a2   :  { %v207_v31 = vadd.f32 %v203_v30, %v34_v3 }
 0x1a3   :  { %v195_v32 = vld [vmem:[#allocation2 + $0x8] sm:$0xff] }
 0x1a4   :  { %v209_v33 = vsel %vm31_vm0, %v207_v31, 0.0  ;;  %v204_v34 = vadd.f32 %v269_v28, %v195_v32 }
 0x1a5   :  { %210 = vadd.xlane.f32.xlu0 %v209_v33 }
 0x1a6   :  { %v208_v35 = vadd.f32 %v204_v34, %v35_v4 }
 0x1a8   :  { %v212_v36 = vsel %vm31_vm0, %v208_v35, 0.0 }
 0x1a9   :  { %213 = vadd.xlane.f32.xlu0 %v212_v36 }
 0x22e   :  { %v211_v37 = vpop.xlane.xlu0 %210 }
 0x22f   :  { %v216_v38 = vmul.f32 0.03125, %v211_v37 }
 0x231   :  { %v218_v39 = vsub.f32 %v207_v31, %v216_v38 }
 0x232   :  { %v214_v40 = vpop.xlane.xlu0 %213 }
 0x233   :  { %v217_v41 = vmul.f32 0.03125, %v214_v40  ;;  %v220_v42 = vmul.f32 %v218_v39, %v218_v39 }
 0x235   :  { %v219_v43 = vsub.f32 %v208_v35, %v217_v41  ;;  %v222_v44 = vsel %vm31_vm0, %v220_v42, 0.0 }
 0x236   :  { %223 = vadd.xlane.f32.xlu1 %v222_v44 }
 0x237   :  { %v221_v45 = vmul.f32 %v219_v43, %v219_v43 }
 0x239   :  { %v225_v46 = vsel %vm31_vm0, %v221_v45, 0.0 }
 0x23a   :  { %226 = vadd.xlane.f32.xlu1 %v225_v46 }
 0x2bf   :  { %v224_v47 = vpop.xlane.xlu1 %223 }
 0x2c0   :  { %v228_v48 = vmul.f32 0.03125, %v224_v47 }
 0x2c2   :  { %v230_v49 = vadd.f32 1e-05, %v228_v48 }
 0x2c3   :  { %v227_v50 = vpop.xlane.xlu1 %226 }
 0x2c4   :  { %308 = vrsqrt.f32 %v230_v49  ;;  %v229_v51 = vmul.f32 0.03125, %v227_v50 }
 0x2c6   :  { %v231_v52 = vadd.f32 1e-05, %v229_v51 }
 0x2c8   :  { %310 = vrsqrt.f32 %v231_v52 }
 0x2d1   :  { %v309_v53 = vpop.eup %308 }
 0x2d2   :  { %v234_v55 = vmul.f32 %v309_v53, %v218_v39 }
 0x2d4   :  { %v243_v57 = vmul.f32 %v270_v54, %v234_v55 }
 0x2d5   :  { %v311_v58 = vpop.eup %310 }
 0x2d6   :  { %v252_v59 = vadd.f32 %v271_v56, %v243_v57  ;;  %v235_v60 = vmul.f32 %v311_v58, %v219_v43 }
 0x2d8   :  { %254 = vst.msk [vmem:[%s414_s7] sm:$0xff] %vm31_vm0, %v252_v59  ;;  %v244_v61 = vmul.f32 %v270_v54, %v235_v60 }
 0x2da   :  { %v253_v62 = vadd.f32 %v271_v56, %v244_v61 }
 0x2dc   :  { %255 = vst.msk [vmem:[%s414_s7 + $0x8] sm:$0xff] %vm31_vm0, %v253_v62 }

// kernel: transformer_encoder_rpr.5
= control target key start
LH: loop header
LB: loop body
LE: loop exit
PB: predicated region body
PF: predicated region fallthrough
CT: control target
= control target key end

     0   :  { %s1283_s30 = smov 0   ;;  %s1419_s0 = inlined_call_operand.vmem [shape: f32[2,8,32], index: 0, kind: input, shape index: {}]   ;;  %s1420_s1 = inlined_call_operand.vmem [shape: bf16[32,96], index: 1, kind: input, shape index: {}]   ;;  %s1421_s2 = inlined_call_operand.vmem [shape: f32[1,96], index: 2, kind: input, shape index: {}]   ;;  %s1422_s3 = inlined_call_operand.vmem [shape: bf16[32,32], index: 3, kind: input, shape index: {}]   ;;  %s1423_s4 = inlined_call_operand.vmem [shape: f32[1,32], index: 4, kind: input, shape index: {}]   ;;  %s1424_s5 = inlined_call_operand.vmem [shape: f32[1,32], index: 5, kind: input, shape index: {}]   ;;  %s1425_s6 = inlined_call_operand.vmem [shape: f32[1,32], index: 6, kind: input, shape index: {}]   ;;  %s1426_s7 = inlined_call_operand.vmem [shape: f32[8,8], index: 7, kind: input, shape index: {}]   ;;  %s1427_s8 = inlined_call_operand.vmem [shape: f32[2,1,8], index: 8, kind: input, shape index: {}]   ;;  %s1428_s9 = inlined_call_operand.vmem [shape: f32[2,8,32], index: 9, kind: output, shape index: {}]  }
   0x1 LB: > { %s1049_s10 = sadd.s32 4294967295, %s1215_s30   ;;  %p1053_p0 = scmp.ge.s32.totalorder %s1215_s30, 1  ;;  %s1215_s30 = sphi %s1283_s30, %s19_s30  }
   0x2   : > { %p294_p1 = scmp.lt.s32.totalorder %s1215_s30, 3 }
   0x4   : > { %p295_p2 = pnand %p1053_p0, %p294_p1 }
   0x5   : > { %p331_p3 = scmp.lt.s32.totalorder (!%p295_p2), %s1049_s10, 1  ;;  %s1219_s21 = smov (!%p295_p2), 120  }
   0x6   : > { %298 = sbr.rel (%p295_p2) target bundleno = 1568 (0x620), region = 56  ;;  %s1220_s22 = smov (!%p295_p2), 96  }
   0x7   : > { %s1221_s23 = smov (!%p295_p2), 80   ;;  %s1222_s24 = smov (!%p295_p2), 88  }
   0x8   : > { %s1223_s25 = smov (!%p295_p2), 72   ;;  %s1224_s26 = smov (!%p295_p2), 112  }
   0x9   : > { %s1225_s27 = smov (!%p295_p2), 104   ;;  %s1226_s14 = smov (!%p295_p2), 56  }
   0xa   : > { %s1227_s16 = smov (!%p295_p2), 64   ;;  %s1228_s17 = smov (!%p295_p2), 40  }
   0xb   : > { %v1187_v0 = vld [vmem:[%s1420_s1 + $0x8] sm:$0xff]   ;;  %v1217_v1 = vmov 0.0   ;;  %v1188_v2 = vld [vmem:[%s1420_s1] sm:$0xff]   ;;  %vm1218_vm0 = vmmov 0   ;;  %s1430_s10 = smov (!%p331_p3, %s1049_s10), 1  ;;  %vm368_vm1 = vcmask 261120  }
   0xc   : > { %1099 = vmatprep.subr.bf16.mxu0 %v1217_v1  ;;  %1107 = vmatprep.subr.bf16.mxu1 %v1217_v1  ;;  %s1054_s15 = sshll.u32 %s1430_s10, 3  ;;  %v1056_v5 = vld [vmem:[%s1421_s2] ss:$0 sm:$0xff]  ;;  %vm425_vm2 = vcmask 64512   ;;  %s337_s11 = scalar_lea.vmem %s1427_s8, %s1430_s10  ;;  %vm489_vm3 = vcmask 1043456   ;;  %vm884_vm4 = vcmask 130048  }
   0xd   : > { %1100 = vmatpush3.bf16.msra.mxu0 %v1187_v0  ;;  %1103 = vmatprep.mubr.msk.bf16.mxu0 %vm1218_vm0, %v1217_v1  ;;  %s334_s18 = scalar_lea.vmem %s1419_s0, %s1054_s15  ;;  %v412_v23 = vld [vmem:[%s1426_s7] sm:$0xff]  ;;  %s1230_s19 = smov 8   ;;  %vm886_vm5 = vcmask 195584  }
   0xe   : > { %1101 = vmatprep.subr.bf16.mxu0 %v1217_v1  ;;  %1109 = vmatprep.mubr.msk.bf16.mxu1 %vm1218_vm0, %v1217_v1  ;;  %v1313_v3 = vld [vmem:[%s334_s18] sm:$0xff]  ;;  %s1229_s18 = smov 48  }
   0xf   : > { %v344_v4 = vpack.c.bf16 %v1313_v3, %v1313_v3  ;;  %v1060_v24 = vld [vmem:[%s337_s11] ss:$0 sm:$0xff] }
  0x10   : > { %v420_v25 = vadd.f32 %v1060_v24, %v412_v23 }
  0x11   : > { %1102 = vmatpush3.bf16.msra.mxu0 %v1188_v2 }
  0x12   : > { %1113 = vmatprep.subr.bf16.mxu0 %v1217_v1 }
  0x14   : > { %1104 = vmatmul.mubr.msk.bf16.vlgmr.msra.gmra.mxu0 %vm368_vm1, %v344_v4 }
  0x15   : > { %1115 = vmatprep.mubr.msk.bf16.mxu0 %vm1218_vm0, %v1217_v1 }
  0xd4   : > { %v406_v6 = vpop.f32.mrf.mxu0 }
  0xd5   : > { %v407_v7 = vadd.f32 %v1056_v5, %v406_v6 }
  0xd6   : > { %v1105_v8 = vpop.f32.mrf.mxu0 }
  0xd7   : > { %v1323_v9 = vpack.c.bf16 %v407_v7, %v407_v7 }
  0xd8   : > { %v409_v10 = vpop.f32.mrf.mxu0 }
  0xd9   : > { %535 = vrot.lane.b32.xlu1 %v1323_v9, %s1219_s21  ;;  %423 = vrot.lane.b32.xlu0 %v1323_v9, %s1220_s22 }
  0xda   : > { %v1106_v11 = vpop.f32.mrf.mxu0 }
  0xdd   : > { %649 = vrot.lane.b32.xlu1 %v1323_v9, %s1221_s23  ;;  %537 = vrot.lane.b32.xlu0 %v1323_v9, %s1222_s24  ;;  %s1231_s24 = smov 16  }
  0xe1   : > { %761 = vrot.lane.b32.xlu1 %v1323_v9, %s1223_s25  ;;  %647 = vrot.lane.b32.xlu0 %v1323_v9, %s1224_s26  ;;  %s1232_s25 = smov 24  }
  0xe5   : > { %759 = vrot.lane.b32.xlu0 %v1323_v9, %s1225_s27 }
 0x14b   : > { %v424_v12 = vpop.permute.xlu0 %423  ;;  %v536_v15 = vpop.permute.xlu1 %535 }
 0x14c   : > { %v430_v13 = vsel %vm425_vm2, %v424_v12, 0 }
 0x14d   : > { %1108 = vmatpush3.bf16.xpose.msra.mxu1 %v430_v13 }
 0x14e   : > { %1119 = vmatprep.subr.bf16.mxu1 %v1217_v1 }
 0x14f   : > { %v538_v14 = vpop.permute.xlu0 %537  ;;  %v650_v17 = vpop.permute.xlu1 %649 }
 0x150   : > { %v543_v16 = vsel %vm425_vm2, %v538_v14, 0  ;;  %v655_v18 = vsel %vm425_vm2, %v650_v17, 0 }
 0x153   : > { %v762_v19 = vpop.permute.xlu1 %761  ;;  %v648_v20 = vpop.permute.xlu0 %647 }
 0x154   : > { %1110 = vmatmul.mubr.msk.bf16.vlgmr.msra.gmra.mxu1 %vm425_vm2, %v1323_v9  ;;  %v767_v21 = vsel %vm425_vm2, %v762_v19, 0 }
 0x155   : > { %1120 = vmatpush3.bf16.xpose.msra.mxu1 %v543_v16  ;;  %1121 = vmatprep.mubr.msk.bf16.mxu1 %vm1218_vm0, %v1217_v1 }
 0x156   : > { %1131 = vmatprep.subr.bf16.mxu1 %v1217_v1 }
 0x157   : > { %v760_v22 = vpop.permute.xlu0 %759 }
 0x15c   : > { %1122 = vmatmul.mubr.msk.bf16.vlgmr.msra.gmra.mxu1 %vm425_vm2, %v536_v15 }
 0x15d   : > { %1132 = vmatpush3.bf16.xpose.msra.mxu1 %v655_v18  ;;  %1133 = vmatprep.mubr.msk.bf16.mxu1 %vm1218_vm0, %v1217_v1 }
 0x15e   : > { %1143 = vmatprep.subr.bf16.mxu1 %v1217_v1 }
 0x164   : > { %1134 = vmatmul.mubr.msk.bf16.vlgmr.msra.gmra.mxu1 %vm425_vm2, %v648_v20 }
 0x165   : > { %1144 = vmatpush3.bf16.xpose.msra.mxu1 %v767_v21  ;;  %1145 = vmatprep.mubr.msk.bf16.mxu1 %vm1218_vm0, %v1217_v1 }
 0x166   : > { %1155 = vmatprep.subr.bf16.mxu1 %v1217_v1 }
 0x16c   : > { %1146 = vmatmul.mubr.msk.bf16.vlgmr.msra.gmra.mxu1 %vm425_vm2, %v760_v22 }
 0x16d   : > { %1159 = vmatprep.mubr.msk.bf16.mxu1 %vm1218_vm0, %v1217_v1 }
 0x214   : > { %v466_v26 = vpop.f32.mrf.mxu1 }
 0x215   : > { %v472_v27 = vmul.f32 0.35355338, %v466_v26 }
 0x216   : > { %v1111_v28 = vpop.f32.mrf.mxu1 }
 0x217   : > { %v473_v29 = vadd.f32 %v472_v27, %v420_v25 }
 0x218   : > { %v469_v30 = vpop.f32.mrf.mxu1 }
 0x219   : > { %v474_v31 = vsel %vm425_vm2, %v473_v29, -inf }
 0x21a   : > { %475 = vmax.xlane.f32.xlu1 %v474_v31  ;;  %v1112_v32 = vpop.f32.mrf.mxu1 }
 0x21c   : > { %v579_v33 = vpop.f32.mrf.mxu1 }
 0x21d   : > { %v585_v34 = vmul.f32 0.35355338, %v579_v33 }
 0x21e   : > { %v1123_v35 = vpop.f32.mrf.mxu1 }
 0x21f   : > { %v586_v36 = vadd.f32 %v585_v34, %v420_v25 }
 0x220   : > { %v582_v37 = vpop.f32.mrf.mxu1 }
 0x221   : > { %v587_v38 = vsel %vm425_vm2, %v586_v36, -inf }
 0x222   : > { %588 = vmax.xlane.f32.xlu0 %v587_v38  ;;  %v1124_v39 = vpop.f32.mrf.mxu1 }
 0x224   : > { %v691_v40 = vpop.f32.mrf.mxu1 }
 0x225   : > { %v697_v41 = vmul.f32 0.35355338, %v691_v40  ;;  %v1190_v40 = vld [vmem:[%s1422_s3] sm:$0xff]  }
 0x226   : > { %v1135_v42 = vpop.f32.mrf.mxu1 }
 0x227   : > { %v698_v43 = vadd.f32 %v697_v41, %v420_v25 }
 0x228   : > { %v694_v44 = vpop.f32.mrf.mxu1 }
 0x229   : > { %v699_v45 = vsel %vm425_vm2, %v698_v43, -inf }
 0x22a   : > { %700 = vmax.xlane.f32.xlu0 %v699_v45  ;;  %v1136_v46 = vpop.f32.mrf.mxu1 }
 0x22b   : > { %597 = vrot.lane.b32.xlu1 %v1323_v9, %s1226_s14 }
 0x22c   : > { %v803_v47 = vpop.f32.mrf.mxu1 }
 0x22d   : > { %v809_v51 = vmul.f32 0.35355338, %v803_v47 }
 0x22e   : > { %v1147_v48 = vpop.f32.mrf.mxu1 }
 0x22f   : > { %v810_v52 = vadd.f32 %v809_v51, %v420_v25 }
 0x230   : > { %v806_v49 = vpop.f32.mrf.mxu1 }
 0x231   : > { %v811_v53 = vsel %vm425_vm2, %v810_v52, -inf }
 0x232   : > { %v1148_v50 = vpop.f32.mrf.mxu1 }
 0x240   : > { %484 = vrot.lane.b32.xlu0 %v1323_v9, %s1227_s16  ;;  %s341_s16 = scalar_lea.vmem %s1428_s9, %s1054_s15 }
 0x244   : > { %821 = vrot.lane.b32.xlu0 %v1323_v9, %s1228_s17 }
 0x24f   : > { %812 = vmax.xlane.f32.xlu1 %v811_v53 }
 0x260   : > { %709 = vrot.lane.b32.xlu1 %v1323_v9, %s1229_s18 }
 0x2a3   : > { %v476_v54 = vpop.xlane.xlu1 %475 }
 0x2a4   : > { %v477_v55 = vsub.f32 %v473_v29, %v476_v54 }
 0x2a6   : > { %v478_v56 = vmul.f32 1.442695, %v477_v55 }
 0x2a7   : > { %v598_v4 = vpop.permute.xlu1 %597 }
 0x2a8   : > { %1191 = vpow2.f32 %v478_v56  ;;  %v603_v6 = vsel %vm489_vm3, %v598_v4, 0 }
 0x2ab   : > { %v589_v57 = vpop.xlane.xlu0 %588 }
 0x2ac   : > { %v590_v58 = vsub.f32 %v586_v36, %v589_v57  ;;  %v1189_v36 = vld [vmem:[%s1422_s3 + $0x8] sm:$0xff]  }
 0x2ad   : > { %1156 = vmatpush3.bf16.msra.mxu1 %v1189_v36 }
 0x2ae   : > { %v591_v59 = vmul.f32 1.442695, %v590_v58  ;;  %1157 = vmatprep.subr.bf16.mxu1 %v1217_v1 }
 0x2b0   : > { %1193 = vpow2.f32 %v591_v59 }
 0x2b1   : > { %1158 = vmatpush3.bf16.msra.mxu1 %v1190_v40 }
 0x2b3   : > { %v701_v60 = vpop.xlane.xlu0 %700 }
 0x2b4   : > { %v702_v61 = vsub.f32 %v698_v43, %v701_v60  ;;  %v1069_v60 = vld [vmem:[%s1423_s4] ss:$0 sm:$0xff] }
 0x2b5   : > { %v1192_v63 = vpop.eup %1191 }
 0x2b6   : > { %v703_v62 = vmul.f32 1.442695, %v702_v61  ;;  %v483_v5 = vpack.c.bf16 %v1192_v63, %v1192_v63  ;;  %v480_v9 = vsel %vm425_vm2, %v1192_v63, 0.0 }
 0x2b7   : > { %v485_v0 = vpop.permute.xlu0 %484 }
 0x2b8   : > { %1195 = vpow2.f32 %v703_v62  ;;  %v491_v2 = vsel %vm489_vm3, %v485_v0, 0 }
 0x2b9   : > { %1114 = vmatpush3.bf16.msra.mxu0 %v491_v2 }
 0x2ba   : > { %1125 = vmatprep.subr.bf16.mxu0 %v1217_v1 }
 0x2bb   : > { %v822_v18 = vpop.permute.xlu0 %821 }
 0x2bc   : > { %1116 = vmatmul.mubr.msk.bf16.vlgmr.msra.gmra.mxu0 %vm425_vm2, %v483_v5  ;;  %v827_v20 = vsel %vm489_vm3, %v822_v18, 0 }
 0x2bd   : > { %v1194_v7 = vpop.eup %1193  ;;  %1126 = vmatpush3.bf16.msra.mxu0 %v603_v6  ;;  %1127 = vmatprep.mubr.msk.bf16.mxu0 %vm1218_vm0, %v1217_v1 }
 0x2be   : > { %v593_v8 = vsel %vm425_vm2, %v1194_v7, 0.0  ;;  %1137 = vmatprep.subr.bf16.mxu0 %v1217_v1  ;;  %v596_v10 = vpack.c.bf16 %v1194_v7, %v1194_v7 }
 0x2bf   : > { %594 = vadd.xlane.f32.xlu1 %v593_v8 }
 0x2c3   : > { %481 = vadd.xlane.f32.xlu1 %v480_v9 }
 0x2c4   : > { %1128 = vmatmul.mubr.msk.bf16.vlgmr.msra.gmra.mxu0 %vm425_vm2, %v596_v10 }
 0x2c5   : > { %v1196_v11 = vpop.eup %1195  ;;  %1139 = vmatprep.mubr.msk.bf16.mxu0 %vm1218_vm0, %v1217_v1 }
 0x2c6   : > { %v705_v12 = vsel %vm425_vm2, %v1196_v11, 0.0  ;;  %v708_v19 = vpack.c.bf16 %v1196_v11, %v1196_v11 }
 0x2c7   : > { %706 = vadd.xlane.f32.xlu0 %v705_v12 }
 0x2d8   : > { %v813_v13 = vpop.xlane.xlu1 %812 }
 0x2d9   : > { %v814_v14 = vsub.f32 %v810_v52, %v813_v13 }
 0x2db   : > { %v815_v15 = vmul.f32 1.442695, %v814_v14 }
 0x2dc   : > { %v710_v16 = vpop.permute.xlu1 %709 }
 0x2dd   : > { %1197 = vpow2.f32 %v815_v15  ;;  %v715_v17 = vsel %vm489_vm3, %v710_v16, 0  ;;  %v1074_v16 = vld [vmem:[%s1425_s6] ss:$0 sm:$0xff] }
 0x2de   : > { %1138 = vmatpush3.bf16.msra.mxu0 %v715_v17 }
 0x2df   : > { %1149 = vmatprep.subr.bf16.mxu0 %v1217_v1 }
 0x2e1   : > { %1140 = vmatmul.mubr.msk.bf16.vlgmr.msra.gmra.mxu0 %vm425_vm2, %v708_v19 }
 0x2e2   : > { %1150 = vmatpush3.bf16.msra.mxu0 %v827_v20  ;;  %1151 = vmatprep.mubr.msk.bf16.mxu0 %vm1218_vm0, %v1217_v1 }
 0x2ea   : > { %v1198_v21 = vpop.eup %1197 }
 0x2eb   : > { %v817_v22 = vsel %vm425_vm2, %v1198_v21, 0.0  ;;  %v820_v23 = vpack.c.bf16 %v1198_v21, %v1198_v21 }
 0x2ec   : > { %818 = vadd.xlane.f32.xlu0 %v817_v22 }
 0x2ed   : > { %1152 = vmatmul.mubr.msk.bf16.vlgmr.msra.gmra.mxu0 %vm425_vm2, %v820_v23 }
 0x348   : > { %v595_v24 = vpop.xlane.xlu1 %594 }
 0x349   : > { %1199 = vrcp.f32 %v595_v24 }
 0x34c   : > { %v482_v50 = vpop.xlane.xlu1 %481 }
 0x350   : > { %v707_v35 = vpop.xlane.xlu0 %706 }
 0x351   : > { %1201 = vrcp.f32 %v707_v35 }
 0x356   : > { %v1200_v29 = vpop.eup %1199 }
 0x35e   : > { %v1202_v38 = vpop.eup %1201 }
 0x375   : > { %v819_v37 = vpop.xlane.xlu0 %818 }
 0x376   : > { %1203 = vrcp.f32 %v819_v37 }
 0x377   : > { %1205 = vrcp.f32 %v482_v50 }
 0x37c   : > { %v527_v25 = vpop.f32.mrf.mxu0 }
 0x37e   : > { %v1117_v26 = vpop.f32.mrf.mxu0 }
 0x380   : > { %v530_v27 = vpop.f32.mrf.mxu0 }
 0x382   : > { %v1118_v28 = vpop.f32.mrf.mxu0 }
 0x383   : > { %v1204_v45 = vpop.eup %1203 }
 0x384   : > { %v639_v30 = vpop.f32.mrf.mxu0  ;;  %v1206_v51 = vpop.eup %1205 }
 0x385   : > { %v646_v31 = vmul.f32 %v1200_v29, %v639_v30  ;;  %v534_v54 = vmul.f32 %v1206_v51, %v527_v25 }
 0x386   : > { %v1129_v32 = vpop.f32.mrf.mxu0 }
 0x387   : > { %872 = vrot.lane.b32.xlu0 %v646_v31, %s1230_s19 }
 0x388   : > { %v642_v33 = vpop.f32.mrf.mxu0 }
 0x38a   : > { %v1130_v34 = vpop.f32.mrf.mxu0 }
 0x3a1   : > { %v751_v39 = vpop.f32.mrf.mxu0 }
 0x3a2   : > { %v758_v41 = vmul.f32 %v1202_v38, %v751_v39 }
 0x3a3   : > { %v1141_v42 = vpop.f32.mrf.mxu0 }
 0x3a4   : > { %876 = vrot.lane.b32.xlu1 %v758_v41, %s1231_s24 }
 0x3a5   : > { %v754_v43 = vpop.f32.mrf.mxu0 }
 0x3a7   : > { %v1142_v44 = vpop.f32.mrf.mxu0 }
 0x3ad   : > { %v863_v46 = vpop.f32.mrf.mxu0 }
 0x3ae   : > { %v870_v47 = vmul.f32 %v1204_v45, %v863_v46 }
 0x3af   : > { %v1153_v48 = vpop.f32.mrf.mxu0 }
 0x3b0   : > { %880 = vrot.lane.b32.xlu1 %v870_v47, %s1232_s25 }
 0x3b1   : > { %v866_v1 = vpop.f32.mrf.mxu0 }
 0x3b3   : > { %v1154_v49 = vpop.f32.mrf.mxu0 }
 0x3f9   : > { %v873_v52 = vpop.permute.xlu0 %872 }
 0x3fa   : > { %v883_v55 = vsel %vm425_vm2, %v534_v54, %v873_v52 }
 0x416   : > { %v877_v53 = vpop.permute.xlu1 %876 }
 0x417   : > { %v885_v56 = vsel %vm884_vm4, %v883_v55, %v877_v53 }
 0x422   : > { %v881_v57 = vpop.permute.xlu1 %880 }
 0x423   : > { %v887_v58 = vsel %vm886_vm5, %v885_v56, %v881_v57 }
 0x424   : > { %v888_v59 = vpack.c.bf16 %v887_v58, %v887_v58 }
 0x426   : > { %1160 = vmatmul.mubr.msk.bf16.vlgmr.msra.gmra.mxu1 %vm368_vm1, %v888_v59 }
 0x4e6   : > { %v949_v61 = vpop.f32.mrf.mxu1 }
 0x4e7   : > { %v950_v62 = vadd.f32 %v1069_v60, %v949_v61 }
 0x4e8   : > { %v1161_v63 = vpop.f32.mrf.mxu1 }
 0x4e9   : > { %v955_v0 = vadd.f32 %v950_v62, %v1313_v3  ;;  %v1073_v3 = vld [vmem:[%s1424_s5] ss:$0 sm:$0xff] }
 0x4ea   : > { %v952_v2 = vpop.f32.mrf.mxu1 }
 0x4eb   : > { %v956_v4 = vsel %vm368_vm1, %v955_v0, 0.0 }
 0x4ec   : > { %957 = vadd.xlane.f32.xlu0 %v956_v4  ;;  %v1162_v5 = vpop.f32.mrf.mxu1 }
 0x575   : > { %v958_v6 = vpop.xlane.xlu0 %957 }
 0x576   : > { %v960_v7 = vmul.f32 0.03125, %v958_v6 }
 0x578   : > { %v961_v8 = vsub.f32 %v955_v0, %v960_v7 }
 0x57a   : > { %v962_v9 = vmul.f32 %v961_v8, %v961_v8 }
 0x57c   : > { %v963_v10 = vsel %vm368_vm1, %v962_v9, 0.0 }
 0x57d   : > { %964 = vadd.xlane.f32.xlu1 %v963_v10 }
 0x606   : > { %v965_v11 = vpop.xlane.xlu1 %964 }
 0x607   : > { %v966_v12 = vmul.f32 0.03125, %v965_v11 }
 0x609   : > { %v967_v13 = vadd.f32 1e-05, %v966_v12 }
 0x60b   : > { %1207 = vrsqrt.f32 %v967_v13 }
 0x618   : > { %v1208_v14 = vpop.eup %1207 }
 0x619   : > { %v969_v15 = vmul.f32 %v1208_v14, %v961_v8 }
 0x61b   : > { %v977_v17 = vmul.f32 %v1073_v3, %v969_v15 }
 0x61d   : > { %v985_v18 = vadd.f32 %v1074_v16, %v977_v17 }
 0x61f   : > { %986 = vst.msk [vmem:[%s341_s16] sm:$0xff] %vm368_vm1, %v985_v18 }
 0x620 PF: > { %s19_s30 = sadd.s32 1, %s1215_s30  }
 0x621   : > { %p16_p4 = scmp.ge.s32.totalorder %s19_s30, 4  }
 0x623   :  { %18 = sbr.rel (!%p16_p4) target bundleno = 1 (0x1), region = 89 }

</bundles_post_ra>
